<compile_context>
chip_gen: v7x
topology: tpu7x:2x2x1
jax: 0.10.0
libtpu: 0.0.40
codegen_flags: <defaults>
</compile_context>

<pallas_src>
import jax
import jax.numpy as jnp
from jax.experimental import pallas as pl
from jax.experimental.pallas import tpu as pltpu


def _power_law_kernel(p_ref, d_ref, o_ref):
    # p_ref : SMEM (H,)  f32     -- per-head scale, scalar-prefetched
    # d_ref : VMEM (tR, C)       -- one (batch, row-tile) slab of d
    # o_ref : VMEM (H, tR, C)    -- all heads for that slab
    dtype = d_ref.dtype
    fmax = jnp.finfo(dtype).max
    fmin = jnp.finfo(dtype).min

    d = d_ref[...]
    # torch.nan_to_num(d, nan=fmax): clip handles +/-inf, where handles NaN.
    x = jnp.where(jnp.isnan(d), fmax, jnp.clip(d, fmin, fmax))

    # Per-head scalar multiply; H is small and static so this unrolls.
    # VPU work is fully hidden under the HBM store DMA -- leave it alone.
    for h in range(o_ref.shape[0]):
        o_ref[h] = (p_ref[h] * x).astype(o_ref.dtype)


def _vmem_capacity_bytes():
    try:
        cap = getattr(pltpu.get_tpu_info(), "vmem_capacity_bytes", None)
        if cap:
            return int(cap)
    except Exception:
        pass
    return 64 << 20  # conservative fallback (v7x per-TensorCore size)


def _pick_row_tile(rows, cols, n_heads, itemsize, budget_bytes, min_sublane):
    """Largest row tile t such that t divides rows, t is legal for the
    (8, 128) block constraint, and the double-buffered (input + output)
    working set stays under budget_bytes."""
    per_row = (1 + n_heads) * cols * itemsize * 2  # x2: double buffering
    max_rows = max(1, budget_bytes // per_row)
    legal = [t for t in range(1, rows + 1)
             if rows % t == 0 and (t % min_sublane == 0 or t % 8 == 0 or t == rows)]
    fitting = [t for t in legal if t <= max_rows]
    # Prefer sublane-aligned tiles among those that fit.
    aligned = [t for t in fitting if t % min_sublane == 0]
    if aligned:
        return max(aligned)
    if fitting:
        return max(fitting)
    return min(legal)  # nothing fits the budget: smallest legal tile


def _ensure_two_grid_steps(batch, rows, tile):
    """v7x megacore: 'parallel' axes only help if the grid has >= 2 steps."""
    if batch * (rows // tile) >= 2:
        return tile
    half = tile // 2
    if half >= 8 and tile % 2 == 0 and rows % half == 0 and half % 8 == 0:
        return half
    return tile


def power_law(d, p, *, out_dtype=None):
    """PowerLaw forward.  d: (B, S1, S2); p: (n_heads, 1).
    Returns (B, n_heads, S1, S2)."""
    B, S1, S2 = d.shape
    H = p.shape[0]
    out_dtype = d.dtype if out_dtype is None else jnp.dtype(out_dtype)
    itemsize = jnp.dtype(d.dtype).itemsize
    min_sublane = 8 * (4 // itemsize)       # 8 (f32) / 16 (bf16) / 32 (int8)

    # Lane-dense layout: flatten trailing dims to 128-wide rows when S2 is
    # not a 128-multiple (avoids masked vst.msk on the dominant store path).
    if S2 % 128 == 0:
        rows, cols, flat = S1, S2, False
        d_in = d
    elif (S1 * S2) % 128 == 0:
        rows, cols, flat = (S1 * S2) // 128, 128, True
        d_in = d.reshape(B, rows, cols)     # contiguous reshape: free
    else:
        rows, cols, flat = S1, S2, False    # fallback: correct, possibly masked stores
        d_in = d

    # Per-generation VMEM budgeting (v7x has 64 MiB/TC; v5e/v6e have 128 MiB).
    cap = _vmem_capacity_bytes()
    budget = min(2 * cap // 5, 32 << 20)    # ~25 MiB on v7x, 32 MiB on v5e/v6e
    tR = _pick_row_tile(rows, cols, H, itemsize, budget, min_sublane)
    tR = _ensure_two_grid_steps(B, rows, tR)

    working_set = (1 + H) * tR * cols * itemsize * 2
    vmem_limit = int(min(cap * 3 // 4, max(working_set + (8 << 20), 32 << 20)))

    p_vec = p.reshape(H).astype(jnp.float32)  # tiny parameter -> SMEM prefetch

    out = pl.pallas_call(
        _power_law_kernel,
        out_shape=jax.ShapeDtypeStruct((B, H, rows, cols), out_dtype),
        grid_spec=pltpu.PrefetchScalarGridSpec(
            num_scalar_prefetch=1,
            grid=(B, rows // tR),
            in_specs=[
                # squeezed batch dim; kernel sees a (tR, cols) slab of d
                pl.BlockSpec((None, tR, cols), lambda b, s, p_ref: (b, s, 0)),
            ],
            # squeezed batch dim; all H heads in one lane-dense output block
            out_specs=pl.BlockSpec((None, H, tR, cols),
                                   lambda b, s, p_ref: (b, 0, s, 0)),
        ),
        compiler_params=pltpu.CompilerParams(
            dimension_semantics=("parallel", "parallel"),
            vmem_limit_bytes=vmem_limit),
        cost_estimate=pl.CostEstimate(
            flops=B * H * S1 * S2,
            transcendentals=0,
            bytes_accessed=B * S1 * S2 * itemsize
            + B * H * S1 * S2 * jnp.dtype(out_dtype).itemsize),
    )(p_vec, d_in)

    if flat:
        out = out.reshape(B, H, S1, S2)
    return out


def _xavier_uniform(key, n_heads):
    # torch.nn.init.xavier_uniform_ on an (n_heads, 1) weight:
    # fan_in = 1, fan_out = n_heads, bound = sqrt(6 / (fan_in + fan_out))
    bound = (6.0 / (n_heads + 1.0)) ** 0.5
    return jax.random.uniform(key, (n_heads, 1), jnp.float32, -bound, bound)


def _reference(d, p):
    fmax = jnp.finfo(d.dtype).max
    fmin = jnp.finfo(d.dtype).min
    x = jnp.where(jnp.isnan(d), fmax, jnp.clip(d, fmin, fmax))
    out = x[..., None] * p.reshape(-1)[None, None, None, :]   # (B, S1, S2, H)
    return jnp.transpose(out, (0, 3, 1, 2))                   # (B, H, S1, S2)


if __name__ == "__main__":
    key = jax.random.PRNGKey(0)
    k_d, k_p, k_d2, k_p2 = jax.random.split(key, 4)

    # Case 1: narrow S2 (< 128) -> lane-dense flattened path.
    B, n_heads, S1, S2 = 2, 4, 16, 16
    d = jax.random.uniform(k_d, (B, S1, S2), jnp.float32, -5.0, 5.0)
    d = d.at[0, 0, 0].set(jnp.nan)      # exercise every nan_to_num branch
    d = d.at[0, 1, 2].set(jnp.inf)
    d = d.at[1, 3, 4].set(-jnp.inf)
    p = _xavier_uniform(k_p, n_heads)

    out = jax.block_until_ready(power_law(d, p))
    ref = _reference(d, p)
    assert out.shape == (B, n_heads, S1, S2)
    assert jnp.allclose(out, ref, rtol=1e-6, atol=0.0), "case1 mismatch"

    # Case 2: 128-multiple S2, single batch -> natural layout + megacore split.
    B2, H2, S1b, S2b = 1, 2, 16, 128
    d2 = jax.random.uniform(k_d2, (B2, S1b, S2b), jnp.float32, -3.0, 3.0)
    d2 = d2.at[0, 5, 7].set(jnp.nan)
    p2 = _xavier_uniform(k_p2, H2)

    out2 = jax.block_until_ready(power_law(d2, p2))
    ref2 = _reference(d2, p2)
    assert out2.shape == (B2, H2, S1b, S2b)
    assert jnp.allclose(out2, ref2, rtol=1e-6, atol=0.0), "case2 mismatch"

    print("KERNEL_OK")
</pallas_src>

<mosaic_0001>
module attributes {stable_mosaic.version = 11 : i64} {
  func.func @_power_law_kernel(%arg0: i32, %arg1: i32, %arg2: memref<4xf32, #tpu.memory_space<smem>>, %arg3: memref<1x2x128xf32, #tpu.memory_space<vmem>>, %arg4: memref<1x4x2x128xf32, #tpu.memory_space<vmem>>) attributes {dimension_semantics = [#tpu.dimension_semantics<parallel>, #tpu.dimension_semantics<parallel>], iteration_bounds = array<i64: 2, 1>, scalar_prefetch = 1 : i64, scratch_operands = 0 : i64, tpu.core_type = #tpu.core_type<tc>, window_params = [{transform_indices = @transform_0, window_bounds = array<i64: 1, 2, 128>}, {transform_indices = @transform_1, window_bounds = array<i64: 1, 4, 2, 128>}]} {
    %c0 = arith.constant 0 : index
    %c0_0 = arith.constant 0 : index
    %c0_1 = arith.constant 0 : index
    %0 = vector.load %arg3[%c0, %c0_0, %c0_1] : memref<1x2x128xf32, #tpu.memory_space<vmem>>, vector<1x2x128xf32>
    %1 = vector.shape_cast %0 : vector<1x2x128xf32> to vector<2x128xf32>
    %2 = arith.cmpf one, %1, %1 : vector<2x128xf32>
    %cst = arith.constant -3.40282347E+38 : f32
    %cst_2 = arith.constant 3.40282347E+38 : f32
    %3 = vector.broadcast %cst : f32 to vector<2x128xf32>
    %4 = arith.maximumf %3, %1 : vector<2x128xf32>
    %5 = vector.broadcast %cst_2 : f32 to vector<2x128xf32>
    %6 = arith.minimumf %5, %4 : vector<2x128xf32>
    %cst_3 = arith.constant 3.40282347E+38 : f32
    %7 = vector.broadcast %cst_3 : f32 to vector<2x128xf32>
    %8 = arith.select %2, %7, %6 : vector<2x128xi1>, vector<2x128xf32>
    %c0_4 = arith.constant 0 : index
    %9 = memref.load %arg2[%c0_4] : memref<4xf32, #tpu.memory_space<smem>>
    %10 = vector.broadcast %9 : f32 to vector<2x128xf32>
    %11 = arith.mulf %10, %8 : vector<2x128xf32>
    %c0_5 = arith.constant 0 : index
    %c0_6 = arith.constant 0 : index
    %c0_7 = arith.constant 0 : index
    %c0_8 = arith.constant 0 : index
    %12 = vector.load %arg4[%c0_5, %c0_6, %c0_7, %c0_8] : memref<1x4x2x128xf32, #tpu.memory_space<vmem>>, vector<1x1x2x128xf32>
    %13 = vector.shape_cast %12 : vector<1x1x2x128xf32> to vector<2x128xf32>
    %14 = vector.shape_cast %11 : vector<2x128xf32> to vector<1x1x2x128xf32>
    tpu.vector_store %arg4[%c0_5, %c0_6, %c0_7, %c0_8], %14 {strides = array<i32>} : memref<1x4x2x128xf32, #tpu.memory_space<vmem>>, vector<1x1x2x128xf32>,
    %c1 = arith.constant 1 : index
    %15 = memref.load %arg2[%c1] : memref<4xf32, #tpu.memory_space<smem>>
    %16 = vector.broadcast %15 : f32 to vector<2x128xf32>
    %17 = arith.mulf %16, %8 : vector<2x128xf32>
    %c0_9 = arith.constant 0 : index
    %c1_10 = arith.constant 1 : index
    %c0_11 = arith.constant 0 : index
    %c0_12 = arith.constant 0 : index
    %18 = vector.load %arg4[%c0_9, %c1_10, %c0_11, %c0_12] : memref<1x4x2x128xf32, #tpu.memory_space<vmem>>, vector<1x1x2x128xf32>
    %19 = vector.shape_cast %18 : vector<1x1x2x128xf32> to vector<2x128xf32>
    %20 = vector.shape_cast %17 : vector<2x128xf32> to vector<1x1x2x128xf32>
    tpu.vector_store %arg4[%c0_9, %c1_10, %c0_11, %c0_12], %20 {strides = array<i32>} : memref<1x4x2x128xf32, #tpu.memory_space<vmem>>, vector<1x1x2x128xf32>,
    %c2 = arith.constant 2 : index
    %21 = memref.load %arg2[%c2] : memref<4xf32, #tpu.memory_space<smem>>
    %22 = vector.broadcast %21 : f32 to vector<2x128xf32>
    %23 = arith.mulf %22, %8 : vector<2x128xf32>
    %c0_13 = arith.constant 0 : index
    %c2_14 = arith.constant 2 : index
    %c0_15 = arith.constant 0 : index
    %c0_16 = arith.constant 0 : index
    %24 = vector.load %arg4[%c0_13, %c2_14, %c0_15, %c0_16] : memref<1x4x2x128xf32, #tpu.memory_space<vmem>>, vector<1x1x2x128xf32>
    %25 = vector.shape_cast %24 : vector<1x1x2x128xf32> to vector<2x128xf32>
    %26 = vector.shape_cast %23 : vector<2x128xf32> to vector<1x1x2x128xf32>
    tpu.vector_store %arg4[%c0_13, %c2_14, %c0_15, %c0_16], %26 {strides = array<i32>} : memref<1x4x2x128xf32, #tpu.memory_space<vmem>>, vector<1x1x2x128xf32>,
    %c3 = arith.constant 3 : index
    %27 = memref.load %arg2[%c3] : memref<4xf32, #tpu.memory_space<smem>>
    %28 = vector.broadcast %27 : f32 to vector<2x128xf32>
    %29 = arith.mulf %28, %8 : vector<2x128xf32>
    %c0_17 = arith.constant 0 : index
    %c3_18 = arith.constant 3 : index
    %c0_19 = arith.constant 0 : index
    %c0_20 = arith.constant 0 : index
    %30 = vector.load %arg4[%c0_17, %c3_18, %c0_19, %c0_20] : memref<1x4x2x128xf32, #tpu.memory_space<vmem>>, vector<1x1x2x128xf32>
    %31 = vector.shape_cast %30 : vector<1x1x2x128xf32> to vector<2x128xf32>
    %32 = vector.shape_cast %29 : vector<2x128xf32> to vector<1x1x2x128xf32>
    tpu.vector_store %arg4[%c0_17, %c3_18, %c0_19, %c0_20], %32 {strides = array<i32>} : memref<1x4x2x128xf32, #tpu.memory_space<vmem>>, vector<1x1x2x128xf32>,
    return
  }
  func.func @transform_0(%arg0: i32, %arg1: i32, %arg2: memref<4xf32, #tpu.memory_space<smem>>) -> (i32, i32, i32) {
    %c0_i32 = arith.constant 0 : i32
    %c0_i32_0 = arith.constant 0 : i32
    return %arg0, %arg1, %c0_i32 : i32, i32, i32
  }
  func.func @transform_1(%arg0: i32, %arg1: i32, %arg2: memref<4xf32, #tpu.memory_space<smem>>) -> (i32, i32, i32, i32) {
    %c0_i32 = arith.constant 0 : i32
    %c0_i32_0 = arith.constant 0 : i32
    %c0_i32_1 = arith.constant 0 : i32
    return %arg0, %c0_i32, %arg1, %c0_i32_0 : i32, i32, i32, i32
  }
}

</mosaic_0001>

<bundles_post_ra>
// kernel: tpu_custom_call.1
= control target key start
LH: loop header
LB: loop body
LE: loop exit
PB: predicated region body
PF: predicated region fallthrough
CT: control target
= control target key end

     0   :  { %s697_s0 = inlined_call_operand.hbm [shape: f32[4], index: 0, kind: input, shape index: {}]   ;;  %s698_s1 = inlined_call_operand.hbm [shape: f32[2,2,128], index: 1, kind: input, shape index: {}]   ;;  %s699_s2 = inlined_call_operand.hbm [shape: f32[2,4,2,128], index: 2, kind: output, shape index: {}]  }
   0x1   :  { %s364_s11 = scalar_lea.hbm %s697_s0, 16 }
   0x2   :  { %p365_p0 = scmp.ne.s32.totalorder %s697_s0, %s364_s11  ;;  %p368_p1 = scmp.lt.u32.totalorder %s364_s11, %s697_s0 }
   0x4   :  { %p370_p2 = pnand %p368_p1, %p365_p0 }
   0x6   :  { %373 = shalt.err (!%p370_p2)  }
   0x7   :  { %s490_s16 = smov [#allocation3]  }
   0x8   :  { %8 = dma.hbm_to_smem %s697_s0, 16, %s490_s16, [#allocation2] }
   0x9   :  { %456 = dma.done.wait [#allocation2], 16 }
   0xa   :  { %457 = vsyncadd [#allocation2], 4294967280 }
   0xb   :  { %10 = sfence }
   0xc   :  { %11 = vsyncpa [#allocation5], 0 }
   0xd   :  { %13 = vsyncpa [#allocation5 + $0x1], 0 }
   0xe   :  { %14 = vsyncpa [#allocation6], 0 }
   0xf   :  { %16 = vsyncpa [#allocation6 + $0x1], 0  ;;  %s522_s19 = smov 0   ;;  %s524_s20 = smov 0  }
  0x10   :  { %s526_s21 = smov 0   ;;  %s528_s22 = smov 0  }
  0x11   :  { %s530_s23 = smov 0   ;;  %s532_s24 = smov 0  }
  0x12 LB: > { %s277_s0 = sadd.s32 4294967295, %s488_s24   ;;  %s278_s25 = sadd.s32 4294967294, %s488_s24   ;;  %s488_s24 = sphi %s532_s24, %s22_s24   ;;  %s484_s23 = sphi %s530_s23, %s715_s23   ;;  %s480_s22 = sphi %s528_s22, %s714_s22   ;;  %s476_s21 = sphi %s526_s21, %s713_s21   ;;  %s472_s20 = sphi %s524_s20, %s712_s20   ;;  %s468_s19 = sphi %s522_s19, %s711_s19  }
  0x13   : > { %s34_s26 = sadd.s32 1, %s484_s23  ;;  %s43_s27 = sadd.s32 1, %s476_s21 }
  0x14   : > { %p36_p3 = scmp.ge.s32.totalorder %s34_s26, 2  ;;  %p50_p4 = scmp.ne.s32.totalorder %s476_s21, %s472_s20 }
  0x15   : > { %p51_p5 = scmp.eq.s32.totalorder %s488_s24, 0  ;;  %p56_p6 = scmp.ne.s32.totalorder %s472_s20, %s468_s19 }
  0x16   : > { %s717_s26 = smov (%p36_p3, %s34_s26), 0  ;;  %p57_p8 = scmp.eq.s32.totalorder %s277_s0, 0 }
  0x17   : > { %p563_p7 = por %p51_p5, %p50_p4  ;;  %s38_s29 = ssub.s32 %s484_s23, %s717_s26 }
  0x18   : > { %p82_p9 = scmp.eq.s32.totalorder %s277_s0, 1  ;;  %p41_p10 = scmp.eq.s32.totalorder %s38_s29, 0 }
  0x19   : > { %p569_p11 = por %p57_p8, %p56_p6  ;;  %p88_p13 = scmp.eq.s32.totalorder %s278_s25, 1 }
  0x1a   : > { %p573_p12 = por %p82_p9, %p50_p4  ;;  %p311_p2 = scmp.lt.s32.totalorder %s488_s24, 2 }
  0x1b   : > { %s578_s4 = scalar_select %p41_p10, %s476_s21, %s43_s27  }
  0x1c   : > { %s703_s3 = scalar_select %p573_p12, 1, 0 }
  0x1d   : > { %p580_p0 = por %p88_p13, %p56_p6  ;;  %s108_s6 = sand.u32 1, %s476_s21  }
  0x1e   : > { %s281_s7 = sshll.u32 %s108_s6, 1  ;;  %s282_s8 = sshll.u32 %s484_s23, 5 }
  0x1f   : > { %s704_s5 = scalar_select %p580_p0, 1, 0 }
  0x20   : > { %s591_s11 = scalar_lea.hbm %s698_s1, %s282_s8  ;;  %s112_s12 = scalar_lea.vmem [#allocation4], %s281_s7 }
  0x21   : > { %s120_s13 = sshll.u32 %s112_s12, 4  ;;  %p597_p3 = pnand %p311_p2, %p563_p7  ;;  %s593_s13 = int_to_ptr.vmem [resolvable:$true] %s120_s13 }
  0x22   : > { %s109_s15 = scalar_lea.sflag [#allocation5], %s108_s6  ;;  %s374_s16 = scalar_lea.hbm %s591_s11, 32 }
  0x23   : > { %p375_p6 = scmp.ne.s32.totalorder %s591_s11, %s374_s16  ;;  %p376_p8 = pneg %p597_p3 }
  0x24   : > { %s379_s0 = scalar_lea.hbm %s698_s1, 64  ;;  %p380_p7 = scmp.lt.u32.totalorder %s591_s11, %s698_s1 }
  0x25   : > { %p377_p9 = pnand %p376_p8, %p375_p6  ;;  %p381_p13 = scmp.lt.u32.totalorder %s379_s0, %s374_s16 }
  0x26   : > { %p383_p1 = scmp.lt.u32.totalorder %s374_s16, %s591_s11 }
  0x27   : > { %p378_p10 = pneg %p377_p9  ;;  %p382_p2 = por %p381_p13, %p380_p7 }
  0x29   : > { %p384_p4 = por %p383_p1, %p382_p2 }
  0x2b   : > { %p385_p5 = pnand %p384_p4, %p378_p10 }
  0x2d   : > { %388 = shalt.err (!%p385_p5)
}
  0x2e   : > { %s389_s28 = scalar_lea.vmem %s593_s13, 32  ;;  %s491_s29 = smov [#allocation4]  }
  0x2f   : > { %p390_p6 = scmp.ne.s32.totalorder %s593_s13, %s389_s28  ;;  %s394_s6 = sshll.u32 %s491_s29, 4  ;;  %s395_s6 = int_to_ptr.vmem [resolvable:$false] %s394_s6 }
  0x30   : > { %s396_s7 = scalar_lea.vmem %s395_s6, 64  ;;  %p397_p12 = scmp.lt.s32.totalorder %s593_s13, %s395_s6 }
  0x31   : > { %p392_p9 = pnand %p390_p6, %p376_p8  ;;  %p398_p7 = scmp.lt.s32.totalorder %s396_s7, %s389_s28 }
  0x33   : > { %p393_p0 = pneg %p392_p9  ;;  %p399_p13 = por %p398_p7, %p397_p12 }
  0x35   : > { %p400_p1 = pnand %p399_p13, %p393_p0 }
  0x37   : > { %403 = shalt.err (!%p400_p1)
}
  0x38   : > { %306 = dma.hbm_to_vmem [thread:$0]  (!%p597_p3), %s591_s11, 32, %s593_s13, %s109_s15  }
  0x39   : > { %p706_p4 = scmp.lt.s32.totalorder %s488_s24, 3  ;;  %p707_p5 = scmp.ge.s32.totalorder %s488_s24, 1 }
  0x3b   : > { %p126_p8 = pnand %p707_p5, %p706_p4 }
  0x3c   : > { %s633_s8 = sand.u32 (!%p126_p8), 1, %s472_s20  }
  0x3d   : > { %129 = sbr.rel (%p126_p8) target bundleno = 98 (0x62), region = 24  ;;  %s284_s9 = sshll.u32 (!%p126_p8), %s633_s8, 1 }
  0x3e   : > { %s132_s10 = scalar_lea.sflag (!%p126_p8), [#allocation5], %s633_s8  ;;  %s135_s12 = scalar_lea.vmem (!%p126_p8), [#allocation4], %s284_s9 }
  0x44   : > { %459 = dma.done.wait (%p569_p11), %s132_s10, 32  }
  0x45   : > { %461 = vsyncadd (%p569_p11), %s132_s10, 4294967264  ;;  %s285_s11 = sshll.u32 %s633_s8, 3  ;;  %s159_s13 = sld [smem:[#allocation3]]  ;;  %v154_v0 = vld [vmem:[%s135_s12] sm:$0x3] }
  0x46   : > { %s287_s14 = sld [smem:[#allocation3 + $0x1]]  ;;  %s289_s15 = sld [smem:[#allocation3 + $0x2]]  ;;  %vm155_vm0 = vcmp.ne.f32.partialorder %v154_v0, %v154_v0  ;;  %v286_v1 = vclamps-f32 %v154_v0, 3.4028235e+38 }
  0x47   : > { %s291_s16 = sld [smem:[#allocation3 + $0x3]]  ;;  %s153_s17 = scalar_lea.vmem [#allocation7], %s285_s11 }
  0x48   : > { %s193_s18 = sshll.u32 %s153_s17, 4  ;;  %s298_s0 = sshll.u32 %s480_s22, 7  ;;  %v158_v5 = vsel %vm155_vm0, 3.4028235e+38, %v286_v1  ;;  %s643_s18 = int_to_ptr.vmem [resolvable:$true] %s193_s18 }
  0x49   : > { %s648_s27 = scalar_lea.hbm %s699_s2, %s298_s0  ;;  %s179_s22 = scalar_lea.sflag [#allocation6], %s633_s8 }
  0x4a   : > { %s404_s28 = scalar_lea.vmem %s643_s18, 128  ;;  %p708_p12 = scmp.ne.s32.totalorder %s703_s3, 0 }
  0x4b   : > { %v160_v2 = vstv %s159_s13  ;;  %p405_p11 = scmp.ne.s32.totalorder %s643_s18, %s404_s28  ;;  %s492_s29 = smov [#allocation7]  }
  0x4c   : > { %v164_v3 = vstv %s287_s14  ;;  %v169_v4 = vstv %s289_s15  ;;  %v161_v7 = vmul.f32 %v160_v2, %v158_v5  ;;  %s408_s6 = sshll.u32 %s492_s29, 4  ;;  %s409_s6 = int_to_ptr.vmem [resolvable:$false] %s408_s6 }
  0x4d   : > { %v174_v6 = vstv %s291_s16  ;;  %v165_v8 = vmul.f32 %v164_v3, %v158_v5  ;;  %v170_v9 = vmul.f32 %v169_v4, %v158_v5  ;;  %p406_p0 = pnand %p405_p11, %p708_p12  ;;  %s410_s7 = scalar_lea.vmem %s409_s6, 256 }
  0x4e   : > { %v175_v10 = vmul.f32 %v174_v6, %v158_v5  ;;  %162 = vst [vmem:[%s153_s17] sm:$0x3] %v161_v7  ;;  %p411_p10 = scmp.lt.s32.totalorder %s643_s18, %s409_s6  ;;  %p412_p2 = scmp.lt.s32.totalorder %s410_s7, %s404_s28 }
  0x4f   : > { %288 = vst [vmem:[%s153_s17 + $0x2] sm:$0x3] %v165_v8  ;;  %290 = vst [vmem:[%s153_s17 + $0x4] sm:$0x3] %v170_v9  ;;  %p407_p3 = pneg %p406_p0 }
  0x50   : > { %292 = vst [vmem:[%s153_s17 + $0x6] sm:$0x3] %v175_v10  ;;  %p413_p6 = por %p412_p2, %p411_p10 }
  0x52   : > { %p414_p9 = pnand %p413_p6, %p407_p3 }
  0x54   : > { %417 = shalt.err (!%p414_p9)
}
  0x55   : > { %s418_s9 = scalar_lea.hbm %s648_s27, 128  ;;  %s422_s11 = scalar_lea.hbm %s699_s2, 256 }
  0x56   : > { %p419_p7 = scmp.ne.s32.totalorder %s648_s27, %s418_s9  ;;  %p423_p4 = scmp.lt.u32.totalorder %s648_s27, %s699_s2 }
  0x57   : > { %p424_p5 = scmp.lt.u32.totalorder %s422_s11, %s418_s9  ;;  %p426_p11 = scmp.lt.u32.totalorder %s418_s9, %s648_s27 }
  0x58   : > { %p420_p13 = pnand %p419_p7, %p708_p12 }
  0x59   : > { %p425_p8 = por %p424_p5, %p423_p4 }
  0x5a   : > { %p421_p1 = pneg %p420_p13 }
  0x5b   : > { %p427_p0 = por %p426_p11, %p425_p8 }
  0x5d   : > { %p428_p3 = pnand %p427_p0, %p421_p1 }
  0x5f   : > { %431 = shalt.err (!%p428_p3)
}
  0x60   : > { %s493_s15 = smov 32   ;;  %s494_s16 = smov 2  }
  0x61   : > { %301 = dma.vmem_to_hbm [thread:$0]  (%p708_p12), %s643_s18, 128, %s648_s27, %s179_s22, %s493_s15, %s493_s15, %s494_s16  }
  0x62 PF: > { %s208_s17 = sand.u32 1, %s468_s19   ;;  %p709_p10 = scmp.ne.s32.totalorder %s704_s5, 0 }
  0x63   : > { %p710_p2 = scmp.ge.s32.totalorder %s488_s24, 2  ;;  %s209_s0 = scalar_lea.sflag [#allocation6], %s208_s17 }
  0x65   : > { %p308_p6 = pnand %p710_p2, %p709_p10 }
  0x67   : > { %463 = dma.done.wait (!%p308_p6), %s209_s0, 128  }
  0x68   : > { %465 = vsyncadd (!%p308_p6), %s209_s0, 4294967168  ;;  %s22_s24 = sadd.s32 1, %s488_s24   ;;  %s711_s19 = smov %s472_s20 }
  0x69   : > { %p19_p9 = scmp.ge.s32.totalorder %s22_s24, 4   ;;  %s712_s20 = smov %s476_s21 }
  0x6a   : > { %s713_s21 = smov %s578_s4  ;;  %s714_s22 = smov %s484_s23 }
  0x6b   : > { %s715_s23 = smov %s717_s26  ;;  %21 = sbr.rel (!%p19_p9) target bundleno = 18 (0x12), region = 72 }
  0x72   :  { %214 = vsyncpa [#allocation5], 1 }
  0x73   :  { %216 = vsyncpa [#allocation5 + $0x1], 1 }
  0x74   :  { %217 = vsyncpa [#allocation6], 1 }
  0x75   :  { %219 = vsyncpa [#allocation6 + $0x1], 1 }

</bundles_post_ra>
